<compile_context>
chip_gen: v6e
topology: v6e:2x2x1
jax: 0.10.0
libtpu: 0.0.40
codegen_flags: <defaults>
</compile_context>

<pallas_src>
import jax
import jax.numpy as jnp
from jax.experimental import pallas as pl
from jax.experimental.pallas import tpu as pltpu


def _round_up(x, m):
    return ((x + m - 1) // m) * m


def _tpu_tile_caps():
    """Generation-aware tile caps + VMEM limit (v7x: 64 MiB/TC, v5e/v6e: 128 MiB)."""
    try:
        vmem_cap = pltpu.get_tpu_info().vmem_capacity_bytes
    except Exception:
        vmem_cap = 64 * 1024 * 1024                      # conservative (v7x) fallback
    if vmem_cap >= 100 * 1024 * 1024:                    # v5e / v6e
        return 512, 1024, 96 * 1024 * 1024
    return 256, 512, 48 * 1024 * 1024                    # v7x


def _choose_tiles(I, J, Hb, N, Dp, act_bytes, ti_cap, tj_cap, vmem_limit):
    """Pick (TI, TJ) that fit the double-buffered per-step footprint in VMEM."""
    NDp = N * Dp
    ti = min(ti_cap, _round_up(I, 8))
    tj = min(tj_cap, _round_up(J, 128))

    def footprint(ti_, tj_):
        blocks = (ti_ * Hb + NDp * tj_) * act_bytes      # h_q tile + k^T tile
        blocks += Hb * NDp * act_bytes + NDp * 4         # Wq^T + bias (resident)
        blocks += N * ti_ * tj_ * 4                      # f32 output block
        return 2 * blocks + ti_ * NDp * act_bytes        # double-buffer + q scratch

    budget = int(0.6 * vmem_limit)
    while footprint(ti, tj) > budget and tj > 128:
        tj = max(128, _round_up(tj // 2, 128))
    while footprint(ti, tj) > budget and ti > 8:
        ti = max(8, _round_up(ti // 2, 8))
    return ti, tj


def _make_kernel(n_relations, d_pad):
    N, Dp = n_relations, d_pad

    def kernel(hq_ref, kT_ref, wq_ref, bq_ref, out_ref, q_ref):
        # grid = (batch, i_tile, j_tile); j_tile is the innermost ("arbitrary") axis.
        # Q projection is computed once per (batch, i_tile) and cached in VMEM so it
        # is NOT recomputed for every J tile.
        @pl.when(pl.program_id(2) == 0)
        def _():
            q = jnp.dot(hq_ref[0], wq_ref[...],
                        preferred_element_type=jnp.float32) + bq_ref[...]   # (TI, N*Dp) f32
            q_ref[...] = q.astype(q_ref.dtype)

        kT = kT_ref[0]                                        # (N*Dp, TJ)
        # Tiny static unroll over relation heads; all slices are aligned:
        #   q slice   -> lane offset multiple of 128
        #   k^T slice -> sublane offset multiple of 128
        # so each head score is a plain NN matmul (no relayout / transpose).
        for n in range(N):
            qn = q_ref[:, n * Dp:(n + 1) * Dp]                # (TI, Dp)
            knT = kT[n * Dp:(n + 1) * Dp, :]                  # (Dp, TJ)
            out_ref[n, 0] = jnp.dot(
                qn, knT, preferred_element_type=jnp.float32).astype(out_ref.dtype)

    return kernel


def relation_extractor_forward(h_q, h_k, params, n_relations, head_hidden_size):
    """h_q: (I, B, Hb), h_k: (J, B, Hb) -> relation_score: (N, B, I, J) float32."""
    I, B, Hb = h_q.shape
    J = h_k.shape[0]
    N, D = n_relations, head_hidden_size
    Dp = _round_up(D, 128)                   # pad each head to a full 128-lane tile
    NDp = N * Dp

    compute_dtype = h_q.dtype                # keep caller's dtype (bf16 stays bf16)
    act_bytes = jnp.dtype(compute_dtype).itemsize

    ti_cap, tj_cap, vmem_limit = _tpu_tile_caps()
    TI, TJ = _choose_tiles(I, J, Hb, N, Dp, act_bytes, ti_cap, tj_cap, vmem_limit)
    Ip, Jp = _round_up(I, TI), _round_up(J, TJ)
    n_i, n_j = Ip // TI, Jp // TJ

    # --- weight prep (once, in the wrapper): nn.Linear stores W as (out, in).
    # Zero-pad every head from D to Dp output lanes; padded lanes contribute exact
    # zeros to the Dp-deep score contraction.
    def pad_heads(w, b):
        w3 = jnp.pad(w.reshape(N, D, Hb), ((0, 0), (0, Dp - D), (0, 0)))
        b2 = jnp.pad(b.reshape(N, D), ((0, 0), (0, Dp - D)))
        return w3.reshape(NDp, Hb), b2.reshape(NDp)

    wq_p, bq_p = pad_heads(params["wq"].astype(compute_dtype),
                           params["bq"].astype(jnp.float32))
    wk_p, bk_p = pad_heads(params["wk"].astype(compute_dtype),
                           params["bk"].astype(jnp.float32))

    wq_t = wq_p.T                            # (Hb, N*Dp): kernel contracts directly
    bq_row = bq_p.reshape(1, NDp)            # f32

    # --- K projection hoisted out of the kernel grid: computed exactly once (not
    # per I-tile), in TRANSPOSED layout (B, N*Dp, Jp) so per-head slices in the
    # kernel are sublane slices and the score needs no RHS transpose.
    hk_bjh = jnp.transpose(h_k, (1, 0, 2)).astype(compute_dtype)          # (B, J, Hb)
    k_allT = (jnp.einsum("oh,bjh->boj", wk_p, hk_bjh,
                         preferred_element_type=jnp.float32)
              + bk_p[None, :, None]).astype(compute_dtype)                # (B, N*Dp, J)
    k_allT = jnp.pad(k_allT, ((0, 0), (0, 0), (0, Jp - J)))               # lane-dense J

    hq_bih = jnp.transpose(h_q, (1, 0, 2)).astype(compute_dtype)          # (B, I, Hb)
    hq_bih = jnp.pad(hq_bih, ((0, 0), (0, Ip - I), (0, 0)))               # (B, Ip, Hb)

    cost = pl.CostEstimate(
        flops=2 * B * Ip * Hb * NDp              # q projection (once per (b, i-tile))
              + 2 * B * Ip * Jp * NDp,           # per-head scores
        transcendentals=0,
        bytes_accessed=(B * Ip * Hb * act_bytes
                        + n_i * B * NDp * Jp * act_bytes   # k^T re-read per I-tile
                        + Hb * NDp * act_bytes + NDp * 4
                        + N * B * Ip * Jp * 4),
    )

    # NOTE: Wq^T / bq have constant block indices; pipeline_mode=pl.Buffered(1) could
    # reclaim their second buffer on v7x, but they are small here so it is skipped.
    out = pl.pallas_call(
        _make_kernel(N, Dp),
        out_shape=jax.ShapeDtypeStruct((N, B, Ip, Jp), jnp.float32),
        grid_spec=pltpu.PrefetchScalarGridSpec(
            num_scalar_prefetch=0,
            grid=(B, n_i, n_j),
            in_specs=[
                pl.BlockSpec((1, TI, Hb),  lambda b, it, jt: (b, it, 0)),   # h_q tile
                pl.BlockSpec((1, NDp, TJ), lambda b, it, jt: (b, 0, jt)),   # k^T tile
                pl.BlockSpec((Hb, NDp),    lambda b, it, jt: (0, 0)),       # Wq^T (resident)
                pl.BlockSpec((1, NDp),     lambda b, it, jt: (0, 0)),       # bq
            ],
            out_specs=pl.BlockSpec((N, 1, TI, TJ), lambda b, it, jt: (0, b, it, jt)),
            scratch_shapes=[pltpu.VMEM((TI, NDp), compute_dtype)],          # q cache
        ),
        compiler_params=pltpu.CompilerParams(
            dimension_semantics=("parallel", "parallel", "arbitrary"),
            vmem_limit_bytes=vmem_limit,
        ),
        cost_estimate=cost,
    )(hq_bih, k_allT, wq_t, bq_row)

    return out[:, :, :I, :J]


def init_params(key, n_relations, backbone_hidden_size, head_hidden_size):
    """Deterministic synthetic parameter init (matches nn.Linear shapes)."""
    out_dim = n_relations * head_hidden_size
    k_wq, k_bq, k_wk, k_bk, k_dn = jax.random.split(key, 5)
    scale = 1.0 / jnp.sqrt(backbone_hidden_size)
    return {
        "wq": jax.random.uniform(k_wq, (out_dim, backbone_hidden_size),
                                 jnp.float32, -scale, scale),
        "bq": jax.random.uniform(k_bq, (out_dim,), jnp.float32, -scale, scale),
        "wk": jax.random.uniform(k_wk, (out_dim, backbone_hidden_size),
                                 jnp.float32, -scale, scale),
        "bk": jax.random.uniform(k_bk, (out_dim,), jnp.float32, -scale, scale),
        # dummy_node exists in the module but is unused in forward().
        "dummy_node": jax.random.normal(k_dn, (1, backbone_hidden_size), jnp.float32),
    }


def reference_forward(h_q, h_k, params, n_relations, head_hidden_size):
    I, B, Hb = h_q.shape
    J = h_k.shape[0]
    q = h_q @ params["wq"].T + params["bq"]          # (I, B, N*D)
    k = h_k @ params["wk"].T + params["bk"]          # (J, B, N*D)
    q = q.reshape(I, B, n_relations, head_hidden_size)
    k = k.reshape(J, B, n_relations, head_hidden_size)
    return jnp.einsum("ibnd,jbnd->nbij", q, k)


if __name__ == "__main__":
    # Small shapes consistent with the forward pass; I/J chosen non-aligned to
    # exercise the pad-and-slice path.
    n_relations = 3
    backbone_hidden_size = 32
    head_hidden_size = 16
    I, J, B = 10, 12, 2

    key = jax.random.PRNGKey(0)
    k_params, k_q, k_k = jax.random.split(key, 3)

    params = init_params(k_params, n_relations, backbone_hidden_size, head_hidden_size)
    h_q = jax.random.normal(k_q, (I, B, backbone_hidden_size), jnp.float32)
    h_k = jax.random.normal(k_k, (J, B, backbone_hidden_size), jnp.float32)

    out = relation_extractor_forward(h_q, h_k, params, n_relations, head_hidden_size)
    out = jax.block_until_ready(out)

    ref = reference_forward(h_q, h_k, params, n_relations, head_hidden_size)
    assert out.shape == (n_relations, B, I, J), out.shape
    assert jnp.allclose(out, ref, atol=1e-4, rtol=1e-4), float(jnp.abs(out - ref).max())

    print("KERNEL_OK")
</pallas_src>

<mosaic_0001>
module attributes {stable_mosaic.version = 11 : i64} {
  func.func @kernel(%arg0: i32, %arg1: i32, %arg2: i32, %arg3: memref<1x16x32xf32, #tpu.memory_space<vmem>>, %arg4: memref<1x384x128xf32, #tpu.memory_space<vmem>>, %arg5: memref<32x384xf32, #tpu.memory_space<vmem>>, %arg6: memref<1x384xf32, #tpu.memory_space<vmem>>, %arg7: memref<3x1x16x128xf32, #tpu.memory_space<vmem>>, %arg8: memref<16x384xf32, #tpu.memory_space<vmem>>) attributes {dimension_semantics = [#tpu.dimension_semantics<parallel>, #tpu.dimension_semantics<parallel>, #tpu.dimension_semantics<arbitrary>], iteration_bounds = array<i64: 2, 1, 1>, scalar_prefetch = 0 : i64, scratch_operands = 1 : i64, tpu.core_type = #tpu.core_type<tc>, window_params = [{transform_indices = @transform_0, window_bounds = array<i64: 1, 16, 32>}, {transform_indices = @transform_1, window_bounds = array<i64: 1, 384, 128>}, {pipeline_mode = #tpu.pipeline_mode<synchronous>, transform_indices = @transform_2, window_bounds = array<i64: 32, 384>}, {pipeline_mode = #tpu.pipeline_mode<synchronous>, transform_indices = @transform_3, window_bounds = array<i64: 1, 384>}, {transform_indices = @transform_4, window_bounds = array<i64: 3, 1, 16, 128>}]} {
    %c0_i32 = arith.constant 0 : i32
    %0 = arith.cmpi eq, %arg2, %c0_i32 : i32
    %1 = arith.extui %0 : i1 to i32
    %c0_i32_0 = arith.constant 0 : i32
    %2 = arith.cmpi ne, %1, %c0_i32_0 : i32
    scf.if %2 {
      %c0_19 = arith.constant 0 : index
      %c0_20 = arith.constant 0 : index
      %c0_21 = arith.constant 0 : index
      %23 = vector.load %arg3[%c0_19, %c0_20, %c0_21] : memref<1x16x32xf32, #tpu.memory_space<vmem>>, vector<1x16x32xf32>
      %24 = vector.shape_cast %23 : vector<1x16x32xf32> to vector<16x32xf32>
      %c0_22 = arith.constant 0 : index
      %c0_23 = arith.constant 0 : index
      %25 = vector.load %arg5[%c0_22, %c0_23] : memref<32x384xf32, #tpu.memory_space<vmem>>, vector<32x384xf32>
      %cst_24 = arith.constant dense<0.000000e+00> : vector<16x384xf32>
      %26 = tpu.matmul %24, %25, %cst_24 {dimension_numbers = #tpu.dot_dimension_numbers<[1], [0], [0], [1], [0, 0, 1, 1], [], []>} : vector<16x32xf32>, vector<32x384xf32>, vector<16x384xf32> -> vector<16x384xf32>
      %c0_25 = arith.constant 0 : index
      %c0_26 = arith.constant 0 : index
      %27 = vector.load %arg6[%c0_25, %c0_26] : memref<1x384xf32, #tpu.memory_space<vmem>>, vector<1x384xf32>
      %28 = vector.broadcast %27 : vector<1x384xf32> to vector<16x384xf32>
      %29 = arith.addf %26, %28 : vector<16x384xf32>
      %c0_27 = arith.constant 0 : index
      %c0_28 = arith.constant 0 : index
      %30 = vector.load %arg8[%c0_27, %c0_28] : memref<16x384xf32, #tpu.memory_space<vmem>>, vector<16x384xf32>
      tpu.vector_store %arg8[%c0_27, %c0_28], %29 {strides = array<i32>} : memref<16x384xf32, #tpu.memory_space<vmem>>, vector<16x384xf32>,
    } else {
    }
    %c0 = arith.constant 0 : index
    %c0_1 = arith.constant 0 : index
    %c0_2 = arith.constant 0 : index
    %3 = vector.load %arg4[%c0, %c0_1, %c0_2] : memref<1x384x128xf32, #tpu.memory_space<vmem>>, vector<1x384x128xf32>
    %4 = vector.shape_cast %3 : vector<1x384x128xf32> to vector<384x128xf32>
    %c0_3 = arith.constant 0 : index
    %c0_4 = arith.constant 0 : index
    %5 = vector.load %arg8[%c0_3, %c0_4] : memref<16x384xf32, #tpu.memory_space<vmem>>, vector<16x128xf32>
    %6 = vector.extract_strided_slice %4 {offsets = [0, 0], sizes = [128, 128], strides = [1, 1]} : vector<384x128xf32> to vector<128x128xf32>
    %cst = arith.constant dense<0.000000e+00> : vector<16x128xf32>
    %7 = tpu.matmul %5, %6, %cst {dimension_numbers = #tpu.dot_dimension_numbers<[1], [0], [0], [1], [0, 0, 1, 1], [], []>} : vector<16x128xf32>, vector<128x128xf32>, vector<16x128xf32> -> vector<16x128xf32>
    %c0_5 = arith.constant 0 : index
    %c0_6 = arith.constant 0 : index
    %c0_7 = arith.constant 0 : index
    %c0_8 = arith.constant 0 : index
    %8 = vector.load %arg7[%c0_5, %c0_6, %c0_7, %c0_8] : memref<3x1x16x128xf32, #tpu.memory_space<vmem>>, vector<1x1x16x128xf32>
    %9 = vector.shape_cast %8 : vector<1x1x16x128xf32> to vector<16x128xf32>
    %10 = vector.shape_cast %7 : vector<16x128xf32> to vector<1x1x16x128xf32>
    tpu.vector_store %arg7[%c0_5, %c0_6, %c0_7, %c0_8], %10 {strides = array<i32>} : memref<3x1x16x128xf32, #tpu.memory_space<vmem>>, vector<1x1x16x128xf32>,
    %c0_9 = arith.constant 0 : index
    %c128 = arith.constant 128 : index
    %11 = vector.load %arg8[%c0_9, %c128] : memref<16x384xf32, #tpu.memory_space<vmem>>, vector<16x128xf32>
    %12 = vector.extract_strided_slice %4 {offsets = [128, 0], sizes = [128, 128], strides = [1, 1]} : vector<384x128xf32> to vector<128x128xf32>
    %cst_10 = arith.constant dense<0.000000e+00> : vector<16x128xf32>
    %13 = tpu.matmul %11, %12, %cst_10 {dimension_numbers = #tpu.dot_dimension_numbers<[1], [0], [0], [1], [0, 0, 1, 1], [], []>} : vector<16x128xf32>, vector<128x128xf32>, vector<16x128xf32> -> vector<16x128xf32>
    %c1 = arith.constant 1 : index
    %c0_11 = arith.constant 0 : index
    %c0_12 = arith.constant 0 : index
    %c0_13 = arith.constant 0 : index
    %14 = vector.load %arg7[%c1, %c0_11, %c0_12, %c0_13] : memref<3x1x16x128xf32, #tpu.memory_space<vmem>>, vector<1x1x16x128xf32>
    %15 = vector.shape_cast %14 : vector<1x1x16x128xf32> to vector<16x128xf32>
    %16 = vector.shape_cast %13 : vector<16x128xf32> to vector<1x1x16x128xf32>
    tpu.vector_store %arg7[%c1, %c0_11, %c0_12, %c0_13], %16 {strides = array<i32>} : memref<3x1x16x128xf32, #tpu.memory_space<vmem>>, vector<1x1x16x128xf32>,
    %c0_14 = arith.constant 0 : index
    %c256 = arith.constant 256 : index
    %17 = vector.load %arg8[%c0_14, %c256] : memref<16x384xf32, #tpu.memory_space<vmem>>, vector<16x128xf32>
    %18 = vector.extract_strided_slice %4 {offsets = [256, 0], sizes = [128, 128], strides = [1, 1]} : vector<384x128xf32> to vector<128x128xf32>
    %cst_15 = arith.constant dense<0.000000e+00> : vector<16x128xf32>
    %19 = tpu.matmul %17, %18, %cst_15 {dimension_numbers = #tpu.dot_dimension_numbers<[1], [0], [0], [1], [0, 0, 1, 1], [], []>} : vector<16x128xf32>, vector<128x128xf32>, vector<16x128xf32> -> vector<16x128xf32>
    %c2 = arith.constant 2 : index
    %c0_16 = arith.constant 0 : index
    %c0_17 = arith.constant 0 : index
    %c0_18 = arith.constant 0 : index
    %20 = vector.load %arg7[%c2, %c0_16, %c0_17, %c0_18] : memref<3x1x16x128xf32, #tpu.memory_space<vmem>>, vector<1x1x16x128xf32>
    %21 = vector.shape_cast %20 : vector<1x1x16x128xf32> to vector<16x128xf32>
    %22 = vector.shape_cast %19 : vector<16x128xf32> to vector<1x1x16x128xf32>
    tpu.vector_store %arg7[%c2, %c0_16, %c0_17, %c0_18], %22 {strides = array<i32>} : memref<3x1x16x128xf32, #tpu.memory_space<vmem>>, vector<1x1x16x128xf32>,
    return
  }
  func.func @transform_0(%arg0: i32, %arg1: i32, %arg2: i32) -> (i32, i32, i32) {
    %c0_i32 = arith.constant 0 : i32
    %c0_i32_0 = arith.constant 0 : i32
    return %arg0, %arg1, %c0_i32 : i32, i32, i32
  }
  func.func @transform_1(%arg0: i32, %arg1: i32, %arg2: i32) -> (i32, i32, i32) {
    %c0_i32 = arith.constant 0 : i32
    %c0_i32_0 = arith.constant 0 : i32
    return %arg0, %c0_i32, %arg2 : i32, i32, i32
  }
  func.func @transform_2(%arg0: i32, %arg1: i32, %arg2: i32) -> (i32, i32) {
    %c0_i32 = arith.constant 0 : i32
    %c0_i32_0 = arith.constant 0 : i32
    %c0_i32_1 = arith.constant 0 : i32
    return %c0_i32, %c0_i32_0 : i32, i32
  }
  func.func @transform_3(%arg0: i32, %arg1: i32, %arg2: i32) -> (i32, i32) {
    %c0_i32 = arith.constant 0 : i32
    %c0_i32_0 = arith.constant 0 : i32
    %c0_i32_1 = arith.constant 0 : i32
    return %c0_i32, %c0_i32_0 : i32, i32
  }
  func.func @transform_4(%arg0: i32, %arg1: i32, %arg2: i32) -> (i32, i32, i32, i32) {
    %c0_i32 = arith.constant 0 : i32
    %c0_i32_0 = arith.constant 0 : i32
    return %c0_i32, %arg0, %arg1, %arg2 : i32, i32, i32, i32
  }
}

</mosaic_0001>

<bundles_post_ra>
// kernel: tpu_custom_call.1
= control target key start
LH: loop header
LB: loop body
LE: loop exit
PB: predicated region body
PF: predicated region fallthrough
CT: control target
= control target key end

     0   :  { %s1693_s0 = inlined_call_operand.hbm [shape: f32[2,16,32], index: 0, kind: input, shape index: {}]   ;;  %s1694_s1 = inlined_call_operand.hbm [shape: f32[2,384,128], index: 1, kind: input, shape index: {}]   ;;  %s1695_s2 = inlined_call_operand.hbm [shape: f32[32,384], index: 2, kind: input, shape index: {}]   ;;  %s1696_s3 = inlined_call_operand.vmem [shape: f32[1,384], index: 3, kind: input, shape index: {}]   ;;  %s1697_s4 = inlined_call_operand.hbm [shape: f32[3,2,16,128], index: 4, kind: output, shape index: {}]  }
   0x1   :  { %1702 = sst [smem:[#allocation20_spill]] %s1693_s0 }
   0x2   :  { %1703 = sst [smem:[#allocation21_spill]] %s1695_s2 }
   0x3   :  { %9 = vsyncpa [#allocation4], 0 }
   0x4   :  { %11 = vsyncpa [#allocation4 + $0x1], 0 }
   0x5   :  { %12 = vsyncpa [#allocation7], 0 }
   0x6   :  { %14 = vsyncpa [#allocation7 + $0x1], 0 }
   0x7   :  { %15 = vsyncpa [#allocation5], 0 }
   0x8   :  { %17 = vsyncpa [#allocation5 + $0x1], 0  ;;  %s1442_s15 = smov 0   ;;  %s1444_s16 = smov 0  }
   0x9   :  { %s1446_s17 = smov 0   ;;  %s1448_s18 = smov 0  }
   0xa   :  { %s1450_s19 = smov 0   ;;  %s1452_s20 = smov 0  }
   0xb LB: > { %1704 = sst [smem:[#allocation16_spill]] %s1388_s17  ;;  %s1473_s21 = sadd.s32 4294967295, %s1400_s20   ;;  %s1400_s20 = sphi %s1452_s20, %s23_s20   ;;  %s1396_s19 = sphi %s1450_s19, %s1726_s19   ;;  %s1392_s18 = sphi %s1448_s18, %s1725_s18   ;;  %s1388_s17 = sphi %s1446_s17, %s1721_s17   ;;  %s1384_s16 = sphi %s1444_s16, %s1724_s16   ;;  %s1380_s15 = sphi %s1442_s15, %s1723_s15  }
   0xc   : > { %1705 = sst [smem:[#allocation17_spill]] %s1400_s20  ;;  %s955_s22 = sadd.s32 4294967294, %s1400_s20  }
   0xd   : > { %p64_p0 = scmp.ne.s32.totalorder %s1384_s16, %s1380_s15  ;;  %p65_p1 = scmp.eq.s32.totalorder %s1473_s21, 0 }
   0xe   : > { %p168_p3 = scmp.eq.s32.totalorder %s955_s22, 1  ;;  %p956_p5 = scmp.ge.s32.totalorder %s1400_s20, 1 }
   0xf   : > { %p1482_p4 = por %p65_p1, %p64_p0  ;;  %p175_p7 = scmp.lt.s32.totalorder %s1400_s20, 3 }
  0x10   : > { %p1487_p6 = por %p168_p3, %p64_p0  ;;  %s1402_s26 = smov [#allocation8]  }
  0x11   : > { %p1492_p8 = pnand %p956_p5, %p175_p7  ;;  %s187_s27 = sshll.u32 %s1402_s26, 4  ;;  %s188_s27 = int_to_ptr.vmem [resolvable:$true] %s187_s27 }
  0x12   : > { %s1707_s24 = scalar_select %p1487_p6, 1, 0 }
  0x13   : > { %p1176_p9 = pneg %p1492_p8  ;;  %p958_p10 = scmp.ge.s32.totalorder %s1400_s20, 2 }
  0x14   : > { %s42_s29 = sadd.s32 1, %s1396_s19  ;;  %s1267_s30 = scalar_lea.vmem %s188_s27, 1536 }
  0x15   : > { %p1501_p11 = pnand %p1176_p9, %p65_p1  ;;  %p1268_p13 = scmp.ne.s32.totalorder %s188_s27, %s1267_s30 }
  0x16   : > { %p1275_p5 = scmp.lt.s32.totalorder %s188_s27, %s188_s27  ;;  %p1276_p7 = scmp.lt.s32.totalorder %s1267_s30, %s1267_s30 }
  0x17   : > { %p1258_p12 = pneg %p1501_p11 }
  0x18   : > { %p1277_p2 = por %p1276_p7, %p1275_p5 }
  0x19   : > { %p1270_p0 = pnand %p1268_p13, %p1258_p12 }
  0x1b   : > { %p1271_p3 = pneg %p1270_p0 }
  0x1d   : > { %p1278_p6 = pnand %p1277_p2, %p1271_p3 }
  0x1f   : > { %1281 = shalt.err (!%p1278_p6)
}
  0x20   : > { %s1403_s5 = smov 384   ;;  %s1404_s6 = smov 24  }
  0x21   : > { %s1710_s2 = sld [smem:[#allocation21_spill]]  ;;  %p44_p2 = scmp.ge.s32.totalorder %s42_s29, 2 }
  0x22   : > { %s51_s9 = sadd.s32 1, %s1388_s17  ;;  %p58_p6 = scmp.ne.s32.totalorder %s1388_s17, %s1384_s16 }
  0x23   : > { %p59_p9 = scmp.eq.s32.totalorder %s1400_s20, 0  ;;  %s1728_s29 = smov (%p44_p2, %s42_s29), 0 }
  0x24   : > { %1711 = sst [smem:[#allocation18_spill]] %s1728_s29  ;;  %p1713_p13 = scmp.eq.s32.totalorder %s1473_s21, 1 }
  0x25   : > { %p1519_p12 = por %p59_p9, %p58_p6  ;;  %s46_s12 = ssub.s32 %s1396_s19, %s1728_s29 }
  0x26   : > { %p1525_p0 = por %p1713_p13, %p58_p6  ;;  %p49_p3 = scmp.eq.s32.totalorder %s46_s12, 0 }
  0x27   : > { %1179 = dma.hbm_to_vmem [thread:$0]  (!%p1501_p11), %s1710_s2, 1536, %s188_s27, [#allocation7], %s1403_s5, %s1403_s5, %s1404_s6  }
  0x28   : > { %p1192_p11 = scmp.lt.s32.totalorder %s1400_s20, 2  ;;  %s1533_s13 = sand.u32 1, %s1388_s17  }
  0x29   : > { %s959_s14 = sshll.u32 %s1533_s13, 4  ;;  %s978_s26 = sshll.u32 %s1396_s19, 8 }
  0x2a   : > { %s1537_s22 = scalar_select %p49_p3, %s1388_s17, %s51_s9  }
  0x2b   : > { %s1716_s0 = sld [smem:[#allocation20_spill]]  ;;  %s208_s5 = scalar_lea.vmem [#allocation3], %s959_s14 }
  0x2c   : > { %1715 = sst [smem:[#allocation19_spill]] %s1537_s22  ;;  %s217_s6 = sshll.u32 %s208_s5, 4  ;;  %s218_s6 = int_to_ptr.vmem [resolvable:$true] %s217_s6 }
  0x2d   : > { %p1545_p5 = pnand %p1192_p11, %p1519_p12  ;;  %s227_s8 = sand.u32 1, %s1400_s20  }
  0x2e   : > { %s205_s12 = scalar_lea.sflag [#allocation4], %s1533_s13  ;;  %s1295_s9 = scalar_lea.vmem %s218_s6, 256 }
  0x2f   : > { %p1284_p7 = pneg %p1545_p5  ;;  %p1296_p2 = scmp.ne.s32.totalorder %s218_s6, %s1295_s9 }
  0x30   : > { %s1405_s14 = smov [#allocation3]  }
  0x31   : > { %s216_s30 = scalar_lea.hbm %s1716_s0, %s978_s26  ;;  %p1298_p6 = pnand %p1296_p2, %p1284_p7 }
  0x32   : > { %s1300_s26 = sshll.u32 %s1405_s14, 4  ;;  %s1301_s26 = int_to_ptr.vmem [resolvable:$false] %s1300_s26 }
  0x33   : > { %p1299_p9 = pneg %p1298_p6  ;;  %s1302_s10 = scalar_lea.vmem %s1301_s26, 512 }
  0x34   : > { %p1303_p12 = scmp.lt.s32.totalorder %s218_s6, %s1301_s26  ;;  %p1304_p13 = scmp.lt.s32.totalorder %s1302_s10, %s1295_s9 }
  0x36   : > { %p1305_p11 = por %p1304_p13, %p1303_p12 }
  0x38   : > { %p1306_p3 = pnand %p1305_p11, %p1299_p9 }
  0x3a   : > { %1309 = shalt.err (!%p1306_p3)
}
  0x3b   : > { %s1406_s27 = smov 128   ;;  %s1407_s28 = smov 8  }
  0x3c   : > { %1183 = dma.hbm_to_vmem [thread:$0]  (!%p1545_p5), %s216_s30, 256, %s218_s6, %s205_s12, %s1406_s27, %s1406_s27, %s1407_s28  }
  0x3d   : > { %s1156_s5 = smul.u32 384, %s1533_s13  ;;  %s228_s9 = scalar_lea.sflag [#allocation7], %s227_s8 }
  0x3e   : > { %s1157_s0 = smul.u32 6144, %s1396_s19  ;;  %s1408_s17 = smov [#allocation6]  }
  0x3f   : > { %s231_s22 = scalar_lea.vmem [#allocation6], %s1156_s5  ;;  %s1328_s20 = sshll.u32 %s1408_s17, 4  ;;  %s1329_s20 = int_to_ptr.vmem [resolvable:$false] %s1328_s20 }
  0x40   : > { %s238_s14 = scalar_lea.hbm %s1694_s1, %s1157_s0  ;;  %s239_s26 = sshll.u32 %s231_s22, 4  ;;  %s240_s26 = int_to_ptr.vmem [resolvable:$true] %s239_s26 }
  0x41   : > { %s1323_s10 = scalar_lea.vmem %s240_s26, 6144  ;;  %s1330_s30 = scalar_lea.vmem %s1329_s20, 12288 }
  0x42   : > { %p1324_p2 = scmp.ne.s32.totalorder %s240_s26, %s1323_s10  ;;  %p1331_p12 = scmp.lt.s32.totalorder %s240_s26, %s1329_s20 }
  0x43   : > { %p1332_p13 = scmp.lt.s32.totalorder %s1330_s30, %s1323_s10 }
  0x44   : > { %p1326_p6 = pnand %p1324_p2, %p1284_p7 }
  0x45   : > { %p1333_p11 = por %p1332_p13, %p1331_p12 }
  0x46   : > { %p1327_p9 = pneg %p1326_p6 }
  0x48   : > { %p1334_p3 = pnand %p1333_p11, %p1327_p9 }
  0x4a   : > { %1337 = shalt.err (!%p1334_p3)
}
  0x4b   : > { %1186 = dma.hbm_to_vmem [thread:$0]  (!%p1545_p5), %s238_s14, 6144, %s240_s26, %s228_s9, %s1406_s27, %s1406_s27, %s1407_s28  }
  0x4c   : > { %251 = sbr.rel (%p1492_p8) target bundleno = 533 (0x215), region = 36  ;;  %s1571_s0 = sand.u32 (!%p1492_p8), 1, %s1384_s16  }
  0x4d   : > { %s964_s2 = sshll.u32 (!%p1492_p8), %s1571_s0, 4  ;;  %s254_s17 = scalar_lea.sflag (!%p1492_p8), [#allocation4], %s1571_s0 }
  0x4e   : > { %s1575_s29 = scalar_lea.vmem (!%p1492_p8), [#allocation3], %s964_s2 }
  0x51   : > { %1363 = dma.done.wait (%p1482_p4), %s254_s17, 256  }
  0x52   : > { %1365 = vsyncadd (%p1482_p4), %s254_s17, 4294967040  ;;  %s262_s20 = sand.u32 1, %s1473_s21   ;;  %s1158_s25 = smul.u32 384, %s1571_s0 }
  0x53   : > { %s263_s13 = scalar_lea.sflag [#allocation7], %s262_s20 }
  0x54   : > { %s1583_s22 = scalar_lea.vmem [#allocation6], %s1158_s25 }
  0x55   : > { %1367 = dma.done.wait (%p1482_p4), %s263_s13, 6144  }
  0x56   : > { %1369 = vsyncadd (%p1482_p4), %s263_s13, 4294961152 }
  0x57   : > { %1371 = dma.done.wait (%p65_p1), [#allocation7], 1536  }
  0x58   : > { %1373 = vsyncadd (%p65_p1), [#allocation7], 4294965760  ;;  %v1409_v0 = vmov 0.0   ;;  %v318_v1 = vld [vmem:[#allocation8 + $0x50] sm:$0xff]  ;;  %v317_v2 = vld [vmem:[#allocation8 + $0x48] sm:$0xff]  ;;  %vm337_vm0 = vcmask 261120   ;;  %v322_v48 = vlaneseq }
  0x59   : > { %408 = vmatprep.mubr.f32.mxu1 %v1409_v0  ;;  %v315_v3 = vld [vmem:[#allocation8 + $0x38] sm:$0xff]  ;;  %368 = vmatprep.subr.mxu1 %v318_v1  ;;  %v314_v4 = vld [vmem:[#allocation8 + $0x30] sm:$0xff]  ;;  %v312_v5 = vld [vmem:[#allocation8 + $0x20] sm:$0xff]  ;;  %s1159_s6 = smul.u32 48, %s1571_s0  ;;  %s790_s8 = scalar_lea.sflag [#allocation5], %s1571_s0 }
  0x5a   : > { %369 = vmatpush1.msra.mxu1 %v317_v2  ;;  %v311_v6 = vld [vmem:[#allocation8 + $0x18] sm:$0xff]  ;;  %v309_v7 = vld [vmem:[#allocation8 + $0x8] sm:$0xff]  ;;  %v308_v9 = vld [vmem:[#allocation8] sm:$0xff]  ;;  %v323_v49 = vshrl.u32 %v322_v48, 7 }
  0x5b   : > { %370 = vmatprep.subr.mxu1 %v315_v3  ;;  %v517_v8 = vld [vmem:[%s1583_s22 + $0x78] sm:$0xff]  ;;  %v516_v10 = vld [vmem:[%s1583_s22 + $0x70] sm:$0xff]  ;;  %v316_v13 = vld [vmem:[#allocation8 + $0x40] sm:$0xff]  ;;  %s299_s7 = scalar_lea.vmem [#allocation9], %s1159_s6 }
  0x5c   : > { %371 = vmatpush1.msra.mxu1 %v314_v4  ;;  %1051 = vmatprep.subr.mxu0 %v517_v8  ;;  %v306_v11 = vld [vmem:[%s1575_s29] sm:$0xff]  ;;  %v319_v12 = vld [vmem:[#allocation8 + $0x58] sm:$0xff]  ;;  %v515_v14 = vld [vmem:[%s1583_s22 + $0x68] sm:$0xff]  ;;  %v324_v50 = vsub.s32 0, %v323_v49  ;;  %v328_v52 = vsub.s32 1, %v323_v49  ;;  %v332_v59 = vsub.s32 2, %v323_v49 }
  0x5d   : > { %372 = vmatprep.subr.mxu1 %v312_v5  ;;  %1052 = vmatpush3.msra.mxu0 %v517_v8  ;;  %v307_v15 = vld [vmem:[%s1575_s29 + $0x8] sm:$0xff]  ;;  %v310_v17 = vld [vmem:[#allocation8 + $0x10] sm:$0xff]  ;;  %v514_v18 = vld [vmem:[%s1583_s22 + $0x60] sm:$0xff] }
  0x5e   : > { %373 = vmatpush1.msra.mxu1 %v311_v6  ;;  %1053 = vmatprep.subr.mxu0 %v516_v10  ;;  %v313_v16 = vld [vmem:[#allocation8 + $0x28] sm:$0xff]  ;;  %v533_v19 = vld [vmem:[%s1583_s22 + $0xf8] sm:$0xff]  ;;  %v532_v21 = vld [vmem:[%s1583_s22 + $0xf0] sm:$0xff] }
  0x5f   : > { %374 = vmatprep.subr.mxu1 %v309_v7  ;;  %1054 = vmatpush3.msra.mxu0 %v516_v10  ;;  %v513_v20 = vld [vmem:[%s1583_s22 + $0x58] sm:$0xff]  ;;  %v512_v22 = vld [vmem:[%s1583_s22 + $0x50] sm:$0xff]  ;;  %v531_v23 = vld [vmem:[%s1583_s22 + $0xe8] sm:$0xff] }
  0x60   : > { %375 = vmatpush1.msra.mxu1 %v308_v9  ;;  %1055 = vmatprep.subr.mxu0 %v515_v14  ;;  %v511_v24 = vld [vmem:[%s1583_s22 + $0x48] sm:$0xff]  ;;  %v530_v25 = vld [vmem:[%s1583_s22 + $0xe0] sm:$0xff]  ;;  %v529_v27 = vld [vmem:[%s1583_s22 + $0xd8] sm:$0xff] }
  0x61   : > { %966 = vmatmul.mubr.msk.f32.vlgmr.msra.gmra.mxu1 %vm337_vm0, %v306_v11  ;;  %1040 = vmatprep.subr.mxu1 %v319_v12  ;;  %v510_v26 = vld [vmem:[%s1583_s22 + $0x40] sm:$0xff]  ;;  %v509_v28 = vld [vmem:[%s1583_s22 + $0x38] sm:$0xff]  ;;  %v528_v29 = vld [vmem:[%s1583_s22 + $0xd0] sm:$0xff] }
  0x62   : > { %414 = vmatprep.mubr.f32.mxu1 %v1409_v0  ;;  %1041 = vmatpush3.msra.mxu1 %v319_v12  ;;  %v508_v30 = vld [vmem:[%s1583_s22 + $0x30] sm:$0xff]  ;;  %v527_v31 = vld [vmem:[%s1583_s22 + $0xc8] sm:$0xff]  ;;  %v526_v33 = vld [vmem:[%s1583_s22 + $0xc0] sm:$0xff] }
  0x63   : > { %1042 = vmatprep.subr.mxu1 %v316_v13  ;;  %1056 = vmatpush3.msra.mxu0 %v515_v14  ;;  %v507_v32 = vld [vmem:[%s1583_s22 + $0x28] sm:$0xff]  ;;  %v506_v34 = vld [vmem:[%s1583_s22 + $0x20] sm:$0xff]  ;;  %v525_v35 = vld [vmem:[%s1583_s22 + $0xb8] sm:$0xff] }
  0x64   : > { %1043 = vmatpush3.msra.mxu1 %v316_v13  ;;  %1057 = vmatprep.subr.mxu0 %v514_v18  ;;  %v505_v36 = vld [vmem:[%s1583_s22 + $0x18] sm:$0xff]  ;;  %v524_v37 = vld [vmem:[%s1583_s22 + $0xb0] sm:$0xff]  ;;  %v523_v38 = vld [vmem:[%s1583_s22 + $0xa8] sm:$0xff] }
  0x65   : > { %967 = vmatmul.mubr.msk.f32.gmra.mxu1 %vm337_vm0, %v307_v15  ;;  %1044 = vmatprep.subr.mxu1 %v313_v16  ;;  %v522_v39 = vld [vmem:[%s1583_s22 + $0xa0] sm:$0xff]  ;;  %v504_v40 = vld [vmem:[%s1583_s22 + $0x10] sm:$0xff]  ;;  %v521_v41 = vld [vmem:[%s1583_s22 + $0x98] sm:$0xff] }
  0x66   : > { %1045 = vmatpush3.msra.mxu1 %v313_v16  ;;  %1048 = vmatprep.mubr.msk.f32.mxu1 %vm337_vm0, %v306_v11  ;;  %v503_v42 = vld [vmem:[%s1583_s22 + $0x8] sm:$0xff]  ;;  %v520_v43 = vld [vmem:[%s1583_s22 + $0x90] sm:$0xff]  ;;  %v502_v44 = vld [vmem:[%s1583_s22] sm:$0xff] }
  0x67   : > { %1046 = vmatprep.subr.mxu1 %v310_v17  ;;  %1058 = vmatpush3.msra.mxu0 %v514_v18  ;;  %v519_v45 = vld [vmem:[%s1583_s22 + $0x88] sm:$0xff]  ;;  %v549_v46 = vld [vmem:[%s1583_s22 + $0x178] sm:$0xff]  ;;  %v518_v47 = vld [vmem:[%s1583_s22 + $0x80] sm:$0xff] }
  0x68   : > { %1047 = vmatpush3.msra.mxu1 %v310_v17  ;;  %1059 = vmatprep.subr.mxu0 %v513_v20  ;;  %v320_v51 = vld [vmem:[%s1696_s3] sm:$0x7]  ;;  %v548_v63 = vld [vmem:[%s1583_s22 + $0x170] sm:$0xff]  ;;  %v547_v2 = vld [vmem:[%s1583_s22 + $0x168] sm:$0xff] }
  0x69   : > { %1049 = vmatmul.mubr.msk.f32.vlgmr.msra.gmra.mxu1 %vm337_vm0, %v307_v15  ;;  %1086 = vmatprep.subr.mxu1 %v533_v19  ;;  %v325_v53 = vrot.slane %v320_v51, %v324_v50  ;;  %v329_v54 = vrot.slane %v320_v51, %v328_v52  ;;  %v333_v1 = vrot.slane %v320_v51, %v332_v59  ;;  %v546_v4 = vld [vmem:[%s1583_s22 + $0x160] sm:$0xff]  ;;  %v545_v7 = vld [vmem:[%s1583_s22 + $0x158] sm:$0xff]  ;;  %v544_v8 = vld [vmem:[%s1583_s22 + $0x150] sm:$0xff] }
  0x6a   : > { %1087 = vmatpush3.msra.mxu1 %v533_v19  ;;  %1060 = vmatpush3.msra.mxu0 %v513_v20  ;;  %v543_v9 = vld [vmem:[%s1583_s22 + $0x148] sm:$0xff]  ;;  %v542_v10 = vld [vmem:[%s1583_s22 + $0x140] sm:$0xff]  ;;  %v541_v11 = vld [vmem:[%s1583_s22 + $0x138] sm:$0xff] }
  0x6b   : > { %1088 = vmatprep.subr.mxu1 %v532_v21  ;;  %1061 = vmatprep.subr.mxu0 %v512_v22  ;;  %v540_v12 = vld [vmem:[%s1583_s22 + $0x130] sm:$0xff]  ;;  %v539_v13 = vld [vmem:[%s1583_s22 + $0x128] sm:$0xff]  ;;  %v538_v14 = vld [vmem:[%s1583_s22 + $0x120] sm:$0xff] }
  0x6c   : > { %1089 = vmatpush3.msra.mxu1 %v532_v21  ;;  %1062 = vmatpush3.msra.mxu0 %v512_v22  ;;  %v537_v15 = vld [vmem:[%s1583_s22 + $0x118] sm:$0xff]  ;;  %v536_v16 = vld [vmem:[%s1583_s22 + $0x110] sm:$0xff]  ;;  %v535_v17 = vld [vmem:[%s1583_s22 + $0x108] sm:$0xff] }
  0x6d   : > { %1090 = vmatprep.subr.mxu1 %v531_v23  ;;  %1063 = vmatprep.subr.mxu0 %v511_v24  ;;  %v534_v18 = vld [vmem:[%s1583_s22 + $0x100] sm:$0xff] }
  0x6e   : > { %1091 = vmatpush3.msra.mxu1 %v531_v23  ;;  %1064 = vmatpush3.msra.mxu0 %v511_v24 }
  0x6f   : > { %1092 = vmatprep.subr.mxu1 %v530_v25  ;;  %1065 = vmatprep.subr.mxu0 %v510_v26 }
  0x70   : > { %1093 = vmatpush3.msra.mxu1 %v530_v25  ;;  %1066 = vmatpush3.msra.mxu0 %v510_v26 }
  0x71   : > { %1094 = vmatprep.subr.mxu1 %v529_v27  ;;  %1067 = vmatprep.subr.mxu0 %v509_v28 }
  0x72   : > { %1095 = vmatpush3.msra.mxu1 %v529_v27  ;;  %1068 = vmatpush3.msra.mxu0 %v509_v28 }
  0x73   : > { %1096 = vmatprep.subr.mxu1 %v528_v29  ;;  %1069 = vmatprep.subr.mxu0 %v508_v30 }
  0x74   : > { %1097 = vmatpush3.msra.mxu1 %v528_v29  ;;  %1070 = vmatpush3.msra.mxu0 %v508_v30 }
  0x75   : > { %1098 = vmatprep.subr.mxu1 %v527_v31  ;;  %1071 = vmatprep.subr.mxu0 %v507_v32 }
  0x76   : > { %1099 = vmatpush3.msra.mxu1 %v527_v31  ;;  %1072 = vmatpush3.msra.mxu0 %v507_v32 }
  0x77   : > { %1100 = vmatprep.subr.mxu1 %v526_v33  ;;  %1073 = vmatprep.subr.mxu0 %v506_v34 }
  0x78   : > { %1101 = vmatpush3.msra.mxu1 %v526_v33  ;;  %1074 = vmatpush3.msra.mxu0 %v506_v34 }
  0x79   : > { %1102 = vmatprep.subr.mxu1 %v525_v35  ;;  %1075 = vmatprep.subr.mxu0 %v505_v36 }
  0x7a   : > { %1103 = vmatpush3.msra.mxu1 %v525_v35  ;;  %1076 = vmatpush3.msra.mxu0 %v505_v36 }
  0x7b   : > { %1104 = vmatprep.subr.mxu1 %v524_v37  ;;  %1077 = vmatprep.subr.mxu0 %v504_v40 }
  0x7c   : > { %1105 = vmatpush3.msra.mxu1 %v524_v37  ;;  %1078 = vmatpush3.msra.mxu0 %v504_v40 }
  0x7d   : > { %1106 = vmatprep.subr.mxu1 %v523_v38  ;;  %1079 = vmatprep.subr.mxu0 %v503_v42 }
  0x7e   : > { %1107 = vmatpush3.msra.mxu1 %v523_v38  ;;  %1080 = vmatpush3.msra.mxu0 %v503_v42 }
  0x7f   : > { %1108 = vmatprep.subr.mxu1 %v522_v39  ;;  %1081 = vmatprep.subr.mxu0 %v502_v44 }
  0x80   : > { %1109 = vmatpush3.msra.mxu1 %v522_v39  ;;  %1082 = vmatpush3.msra.mxu0 %v502_v44 }
  0x81   : > { %1110 = vmatprep.subr.mxu1 %v521_v41  ;;  %1121 = vmatprep.subr.mxu0 %v549_v46 }
  0x82   : > { %1111 = vmatpush3.msra.mxu1 %v521_v41 }
  0x83   : > { %1112 = vmatprep.subr.mxu1 %v520_v43 }
  0x84   : > { %1113 = vmatpush3.msra.mxu1 %v520_v43 }
  0x85   : > { %1114 = vmatprep.subr.mxu1 %v519_v45 }
  0x86   : > { %1115 = vmatpush3.msra.mxu1 %v519_v45 }
  0x87   : > { %1116 = vmatprep.subr.mxu1 %v518_v47 }
  0x88   : > { %1117 = vmatpush3.msra.mxu1 %v518_v47 }
 0x121   : > { %v410_v55 = vpop.f32.mrf.mxu1 }
 0x122   : > { %v411_v56 = vadd.f32 %v410_v55, %v325_v53 }
 0x123   : > { %v412_v57 = vpop.f32.mrf.mxu1 }
 0x124   : > { %v413_v58 = vadd.f32 %v412_v57, %v329_v54  ;;  %1083 = vmatprep.mubr.f32.mxu0 %v411_v56 }
 0x125   : > { %v416_v60 = vpop.f32.mrf.mxu1 }
 0x126   : > { %v417_v61 = vadd.f32 %v416_v60, %v325_v53  ;;  %1118 = vmatprep.mubr.f32.mxu1 %v413_v58 }
 0x127   : > { %v418_v62 = vpop.f32.mrf.mxu1 }
 0x128   : > { %v419_v0 = vadd.f32 %v418_v62, %v329_v54  ;;  %1084 = vmatmul.mubr.f32.vlgmr.msra.gmra.mxu0 %v417_v61 }
 0x129   : > { %1122 = vmatpush3.msra.mxu0 %v549_v46  ;;  %v1050_v3 = vpop.f32.mrf.mxu1 }
 0x12a   : > { %1123 = vmatprep.subr.mxu0 %v548_v63  ;;  %1119 = vmatmul.mubr.f32.vlgmr.msra.gmra.mxu1 %v419_v0  ;;  %v493_v19 = vadd.f32 %v1050_v3, %v333_v1 }
 0x12b   : > { %1124 = vmatpush3.msra.mxu0 %v548_v63  ;;  %v487_v5 = vpop.f32.mrf.mxu1 }
 0x12c   : > { %1125 = vmatprep.subr.mxu0 %v547_v2  ;;  %v488_v6 = vadd.f32 %v487_v5, %v333_v1 }
 0x12d   : > { %1126 = vmatpush3.msra.mxu0 %v547_v2 }
 0x12e   : > { %1127 = vmatprep.subr.mxu0 %v546_v4  ;;  %1153 = vmatprep.mubr.f32.mxu0 %v488_v6 }
 0x12f   : > { %1128 = vmatpush3.msra.mxu0 %v546_v4 }
 0x130   : > { %1129 = vmatprep.subr.mxu0 %v545_v7 }
 0x131   : > { %1130 = vmatpush3.msra.mxu0 %v545_v7 }
 0x132   : > { %1131 = vmatprep.subr.mxu0 %v544_v8 }
 0x133   : > { %1132 = vmatpush3.msra.mxu0 %v544_v8 }
 0x134   : > { %1133 = vmatprep.subr.mxu0 %v543_v9 }
 0x135   : > { %1134 = vmatpush3.msra.mxu0 %v543_v9 }
 0x136   : > { %1135 = vmatprep.subr.mxu0 %v542_v10 }
 0x137   : > { %1136 = vmatpush3.msra.mxu0 %v542_v10 }
 0x138   : > { %1137 = vmatprep.subr.mxu0 %v541_v11 }
 0x139   : > { %1138 = vmatpush3.msra.mxu0 %v541_v11 }
 0x13a   : > { %1139 = vmatprep.subr.mxu0 %v540_v12 }
 0x13b   : > { %1140 = vmatpush3.msra.mxu0 %v540_v12 }
 0x13c   : > { %1141 = vmatprep.subr.mxu0 %v539_v13 }
 0x13d   : > { %1142 = vmatpush3.msra.mxu0 %v539_v13 }
 0x13e   : > { %1143 = vmatprep.subr.mxu0 %v538_v14 }
 0x13f   : > { %1144 = vmatpush3.msra.mxu0 %v538_v14 }
 0x140   : > { %1145 = vmatprep.subr.mxu0 %v537_v15 }
 0x141   : > { %1146 = vmatpush3.msra.mxu0 %v537_v15 }
 0x142   : > { %1147 = vmatprep.subr.mxu0 %v536_v16 }
 0x143   : > { %1148 = vmatpush3.msra.mxu0 %v536_v16 }
 0x144   : > { %1149 = vmatprep.subr.mxu0 %v535_v17 }
 0x145   : > { %1150 = vmatpush3.msra.mxu0 %v535_v17 }
 0x146   : > { %1151 = vmatprep.subr.mxu0 %v534_v18 }
 0x147   : > { %1152 = vmatpush3.msra.mxu0 %v534_v18 }
 0x148   : > { %1154 = vmatmul.mubr.f32.vlgmr.msra.gmra.mxu0 %v493_v19 }
 0x1e8   : > { %v1085_v20 = vpop.f32.mrf.mxu0 }
 0x1e9   : > { %628 = vst [vmem:[%s299_s7 + $0x8] sm:$0xff] %v1085_v20 }
 0x1ea   : > { %v618_v21 = vpop.f32.mrf.mxu0  ;;  %v1120_v22 = vpop.f32.mrf.mxu1 }
 0x1eb   : > { %627 = vst [vmem:[%s299_s7] sm:$0xff] %v618_v21  ;;  %971 = vst [vmem:[%s299_s7 + $0x18] sm:$0xff] %v1120_v22 }
 0x1ec   : > { %v697_v23 = vpop.f32.mrf.mxu1 }
 0x1ed   : > { %970 = vst [vmem:[%s299_s7 + $0x10] sm:$0xff] %v697_v23 }
 0x208   : > { %v1155_v24 = vpop.f32.mrf.mxu0 }
 0x209   : > { %973 = vst [vmem:[%s299_s7 + $0x28] sm:$0xff] %v1155_v24 }
 0x20a   : > { %v777_v25 = vpop.f32.mrf.mxu0 }
 0x20b   : > { %972 = vst [vmem:[%s299_s7 + $0x20] sm:$0xff] %v777_v25 }
 0x20c   : > { %s979_s12 = sshll.u32 %s1392_s18, 8  ;;  %s816_s27 = sshll.u32 %s299_s7, 4  ;;  %s817_s27 = int_to_ptr.vmem [resolvable:$true] %s816_s27 }
 0x20d   : > { %s805_s14 = scalar_lea.hbm %s1697_s4, %s979_s12  ;;  %s1410_s26 = smov 256  }
 0x20e   : > { %1168 = sst [smem:[#allocation11]] (%p1525_p0), %s1410_s26  ;;  %s1411_s9 = smov 512  }
 0x20f   : > { %1169 = sst [smem:[#allocation11 + $0x1]] (%p1525_p0), %s1411_s9  ;;  %s1412_s10 = smov 2  }
 0x210   : > { %1170 = sst [smem:[#allocation11 + $0x2]] (%p1525_p0), %s1412_s10  ;;  %s1413_s30 = smov 128  }
 0x211   : > { %1171 = sst [smem:[#allocation11 + $0x3]] (%p1525_p0), %s1413_s30  ;;  %s1414_s18 = smov 8  }
 0x212   : > { %1172 = sst [smem:[#allocation11 + $0x4]] (%p1525_p0), %s1413_s30  ;;  %s1415_s0 = smov 131072  }
 0x213   : > { %1173 = sst [smem:[#allocation11 + $0x5]] (%p1525_p0), %s1414_s18  ;;  %s1416_s2 = smov 0  }
 0x214   : > { %1174 = dma.general (%p1525_p0), %s817_s27, 768, %s805_s14, %s790_s8, %s1415_s0, [#allocation11], %s1416_s2, 0  }
 0x215 PF: > { %s1718_s17 = sld [smem:[#allocation17_spill]]  ;;  %s844_s29 = sand.u32 1, %s1380_s15  }
 0x216   : > { %p1719_p1 = scmp.ne.s32.totalorder %s1707_s24, 0  ;;  %s845_s20 = scalar_lea.sflag [#allocation5], %s844_s29 }
 0x218   : > { %p1188_p4 = pnand %p958_p10, %p1719_p1 }
 0x21a   : > { %p1189_p8 = pneg %p1188_p4 }
 0x21c   : > { %1375 = dma.done.wait (%p1189_p8), %s845_s20, 768  }
 0x21d   : > { %1377 = vsyncadd (%p1189_p8), %s845_s20, 4294966528  ;;  %s23_s20 = sadd.s32 1, %s1718_s17   ;;  %s1720_s25 = sld [smem:[#allocation16_spill]] }
 0x21e   : > { %p20_p5 = scmp.ge.s32.totalorder %s23_s20, 4   ;;  %s1721_s17 = sld [smem:[#allocation19_spill]] }
 0x21f   : > { %s1722_s11 = sld [smem:[#allocation18_spill]]  ;;  %s1723_s15 = smov %s1384_s16 }
 0x220   : > { %s1725_s18 = smov %s1396_s19 }
 0x221   :  { %22 = sbr.rel (!%p20_p5) target bundleno = 11 (0xb), region = 109 }
 0x223   : > { %s1724_s16 = smov %s1720_s25 }
 0x225   : > { %s1726_s19 = smov %s1722_s11 }
 0x226   :  { %850 = vsyncpa [#allocation4], 1 }
 0x227   :  { %852 = vsyncpa [#allocation4 + $0x1], 1 }
 0x228   :  { %853 = vsyncpa [#allocation7], 1 }
 0x229   :  { %855 = vsyncpa [#allocation7 + $0x1], 1 }
 0x22a   :  { %856 = vsyncpa [#allocation5], 1 }
 0x22b   :  { %858 = vsyncpa [#allocation5 + $0x1], 1 }

</bundles_post_ra>
